<compile_context>
chip_gen: v7x
topology: tpu7x:2x2x1
jax: 0.10.0
libtpu: 0.0.40
codegen_flags: <defaults>
</compile_context>

<pallas_src>
import jax
import jax.numpy as jnp
from jax.experimental import pallas as pl
from jax.experimental.pallas import tpu as pltpu

LANE = 128
MAX_LANE_TILE = 32768            # absolute cap on lane tile width
FALLBACK_VMEM_BYTES = 64 << 20   # conservative (v7x physical) if query fails


def _cdiv(a: int, b: int) -> int:
    return -(-a // b)


def _round_up(x: int, m: int) -> int:
    return _cdiv(x, m) * m


def _vmem_capacity_bytes() -> int:
    try:
        return int(pltpu.get_tpu_info().vmem_capacity_bytes)
    except Exception:
        return FALLBACK_VMEM_BYTES


def _shortcut_proj_kernel(w_ref, shift_ref, x_ref, o_ref):
    # w_ref:     (C_out, C_in)  folded conv*BN weight, resident in VMEM
    # shift_ref: (C_out, 1)     folded bias, resident (f32)
    # x_ref:     (C_in, TL)     activation tile, spatial axis lane-dense
    # o_ref:     (C_out, TL)    output tile
    y = jnp.dot(w_ref[...], x_ref[...], preferred_element_type=jnp.float32)
    o_ref[...] = (y + shift_ref[...]).astype(o_ref.dtype)


def shortcut_projection(x, conv_w, conv_b, gamma, beta, running_mean,
                        running_var, *, stride: int = 1, eps: float = 1e-5):
    """JAX/Pallas equivalent of ShortcutProjection.forward (eval-mode BN).

    x:       (N, C_in, L) activations
    conv_w:  (C_out, C_in, 1) Conv1d weight, conv_b: (C_out,)
    gamma/beta/running_mean/running_var: (C_out,) BatchNorm1d params/stats
    """
    N, C_in, L = x.shape
    C_out = conv_w.shape[0]

    # ---- fold eval-mode BN into the 1x1 conv (tiny per-channel ops) ----
    # TODO(synk): training-mode BatchNorm (batch statistics) is not implemented.
    inv_std = jax.lax.rsqrt(running_var.astype(jnp.float32) + eps)
    scale = gamma.astype(jnp.float32) * inv_std                                  # (C_out,)
    w_folded = (conv_w.reshape(C_out, C_in).astype(jnp.float32)
                * scale[:, None]).astype(x.dtype)                                # match act dtype
    shift = ((conv_b.astype(jnp.float32) - running_mean.astype(jnp.float32)) * scale
             + beta.astype(jnp.float32)).reshape(C_out, 1)                       # stays f32

    # ---- stride: a k=1 conv only reads every stride-th spatial position ----
    # TODO(synk): fuse the strided read into the kernel DMA (strided lane loads)
    # to avoid this extra XLA pass when stride > 1.
    x_s = x if stride == 1 else x[:, :, ::stride]
    L_out = x_s.shape[2]

    # ---- VMEM-budget-derived, lane-dense spatial tile ----
    x_bytes = jnp.dtype(x.dtype).itemsize
    w_bytes = jnp.dtype(w_folded.dtype).itemsize
    capacity = _vmem_capacity_bytes()
    usable = min(int(capacity * 3 // 4), 96 << 20)          # per-gen scoped VMEM budget
    fixed = 2 * (C_out * C_in * w_bytes + C_out * 4) + (1 << 20)   # weights/shift + slack
    per_lane = 2 * (C_in * x_bytes + C_out * x_bytes)        # double-buffered in+out tiles
    tl = max(LANE, ((usable - fixed) // per_lane) // LANE * LANE)
    tl = min(tl, MAX_LANE_TILE, _round_up(L_out, LANE))
    # Keep >=2 grid steps when N == 1 so both v7x TensorCores get work.
    if N == 1 and _cdiv(L_out, tl) < 2 and L_out > LANE:
        tl = _round_up(_cdiv(L_out, 2), LANE)

    grid = (N, _cdiv(L_out, tl))   # ragged last lane block is masked by Pallas

    out = pl.pallas_call(
        _shortcut_proj_kernel,
        out_shape=jax.ShapeDtypeStruct((N, C_out, L_out), x.dtype),
        grid_spec=pltpu.PrefetchScalarGridSpec(
            num_scalar_prefetch=0,
            grid=grid,
            in_specs=[
                pl.BlockSpec((C_out, C_in), lambda n, l: (0, 0)),      # resident weights
                pl.BlockSpec((C_out, 1), lambda n, l: (0, 0)),         # resident shift
                pl.BlockSpec((None, C_in, tl), lambda n, l: (n, 0, l)),  # activation tile
            ],
            out_specs=pl.BlockSpec((None, C_out, tl), lambda n, l: (n, 0, l)),
        ),
        compiler_params=pltpu.CompilerParams(
            dimension_semantics=("parallel", "parallel"),
            vmem_limit_bytes=int(usable),
        ),
    )(w_folded, shift, x_s)

    return out


if __name__ == "__main__":
    key = jax.random.PRNGKey(0)
    N, C_in, C_out = 2, 32, 64
    eps = 1e-5

    ks = jax.random.split(key, 9)
    conv_w = jax.random.normal(ks[0], (C_out, C_in, 1), jnp.float32) * (C_in ** -0.5)
    conv_b = jax.random.normal(ks[1], (C_out,), jnp.float32) * 0.1
    gamma = jax.random.uniform(ks[2], (C_out,), jnp.float32, minval=0.5, maxval=1.5)
    beta = jax.random.normal(ks[3], (C_out,), jnp.float32) * 0.1
    running_mean = jax.random.normal(ks[4], (C_out,), jnp.float32) * 0.1
    running_var = jax.random.uniform(ks[5], (C_out,), jnp.float32, minval=0.5, maxval=1.5)

    def reference(x, stride):
        xs = x if stride == 1 else x[:, :, ::stride]
        y = jnp.einsum("oi,nil->nol", conv_w[:, :, 0], xs) + conv_b[None, :, None]
        return ((y - running_mean[None, :, None])
                * jax.lax.rsqrt(running_var + eps)[None, :, None]
                * gamma[None, :, None] + beta[None, :, None])

    # case 1: stride=1, spatial length a multiple of 128 (full-tile path)
    x1 = jax.random.normal(ks[6], (N, C_in, 256), jnp.float32)
    out1 = jax.block_until_ready(
        shortcut_projection(x1, conv_w, conv_b, gamma, beta,
                            running_mean, running_var, stride=1, eps=eps))
    assert out1.shape == (N, C_out, 256)
    assert jnp.allclose(out1, reference(x1, 1), atol=1e-4, rtol=1e-4), "stride=1 mismatch"

    # case 2: stride=2, ragged length (exercises the Pallas-masked partial block)
    x2 = jax.random.normal(ks[7], (N, C_in, 200), jnp.float32)
    out2 = jax.block_until_ready(
        shortcut_projection(x2, conv_w, conv_b, gamma, beta,
                            running_mean, running_var, stride=2, eps=eps))
    assert out2.shape == (N, C_out, 100)
    assert jnp.allclose(out2, reference(x2, 2), atol=1e-4, rtol=1e-4), "stride=2 mismatch"

    # case 3: N == 1 (exercises the "split lane axis into >=2 tiles" path)
    x3 = jax.random.normal(ks[8], (1, C_in, 384), jnp.float32)
    out3 = jax.block_until_ready(
        shortcut_projection(x3, conv_w, conv_b, gamma, beta,
                            running_mean, running_var, stride=1, eps=eps))
    assert out3.shape == (1, C_out, 384)
    assert jnp.allclose(out3, reference(x3, 1), atol=1e-4, rtol=1e-4), "N=1 mismatch"

    print("KERNEL_OK")
</pallas_src>

<mosaic_0001>
module attributes {stable_mosaic.version = 11 : i64} {
  func.func @_shortcut_proj_kernel(%arg0: i32, %arg1: i32, %arg2: memref<64x32xf32, #tpu.memory_space<vmem>>, %arg3: memref<64x1xf32, #tpu.memory_space<vmem>>, %arg4: memref<1x32x256xf32, #tpu.memory_space<vmem>>, %arg5: memref<1x64x256xf32, #tpu.memory_space<vmem>>) attributes {dimension_semantics = [#tpu.dimension_semantics<parallel>, #tpu.dimension_semantics<parallel>], iteration_bounds = array<i64: 2, 1>, scalar_prefetch = 0 : i64, scratch_operands = 0 : i64, tpu.core_type = #tpu.core_type<tc>, window_params = [{pipeline_mode = #tpu.pipeline_mode<synchronous>, transform_indices = @transform_0, window_bounds = array<i64: 64, 32>}, {pipeline_mode = #tpu.pipeline_mode<synchronous>, transform_indices = @transform_1, window_bounds = array<i64: 64, 1>}, {transform_indices = @transform_2, window_bounds = array<i64: 1, 32, 256>}, {transform_indices = @transform_3, window_bounds = array<i64: 1, 64, 256>}]} {
    %c0 = arith.constant 0 : index
    %c0_0 = arith.constant 0 : index
    %0 = vector.load %arg2[%c0, %c0_0] : memref<64x32xf32, #tpu.memory_space<vmem>>, vector<64x32xf32>
    %c0_1 = arith.constant 0 : index
    %c0_2 = arith.constant 0 : index
    %c0_3 = arith.constant 0 : index
    %1 = vector.load %arg4[%c0_1, %c0_2, %c0_3] : memref<1x32x256xf32, #tpu.memory_space<vmem>>, vector<1x32x256xf32>
    %2 = vector.shape_cast %1 : vector<1x32x256xf32> to vector<32x256xf32>
    %cst = arith.constant dense<0.000000e+00> : vector<64x256xf32>
    %3 = tpu.matmul %0, %2, %cst {dimension_numbers = #tpu.dot_dimension_numbers<[1], [0], [0], [1], [0, 0, 1, 1], [], []>} : vector<64x32xf32>, vector<32x256xf32>, vector<64x256xf32> -> vector<64x256xf32>
    %c0_4 = arith.constant 0 : index
    %c0_5 = arith.constant 0 : index
    %4 = vector.load %arg3[%c0_4, %c0_5] : memref<64x1xf32, #tpu.memory_space<vmem>>, vector<64x1xf32>
    %5 = vector.broadcast %4 : vector<64x1xf32> to vector<64x256xf32>
    %6 = arith.addf %3, %5 : vector<64x256xf32>
    %c0_6 = arith.constant 0 : index
    %c0_7 = arith.constant 0 : index
    %c0_8 = arith.constant 0 : index
    %7 = vector.load %arg5[%c0_6, %c0_7, %c0_8] : memref<1x64x256xf32, #tpu.memory_space<vmem>>, vector<1x64x256xf32>
    %8 = vector.shape_cast %7 : vector<1x64x256xf32> to vector<64x256xf32>
    %9 = vector.shape_cast %6 : vector<64x256xf32> to vector<1x64x256xf32>
    tpu.vector_store %arg5[%c0_6, %c0_7, %c0_8], %9 {strides = array<i32>} : memref<1x64x256xf32, #tpu.memory_space<vmem>>, vector<1x64x256xf32>,
    return
  }
  func.func @transform_0(%arg0: i32, %arg1: i32) -> (i32, i32) {
    %c0_i32 = arith.constant 0 : i32
    %c0_i32_0 = arith.constant 0 : i32
    %c0_i32_1 = arith.constant 0 : i32
    return %c0_i32, %c0_i32_0 : i32, i32
  }
  func.func @transform_1(%arg0: i32, %arg1: i32) -> (i32, i32) {
    %c0_i32 = arith.constant 0 : i32
    %c0_i32_0 = arith.constant 0 : i32
    %c0_i32_1 = arith.constant 0 : i32
    return %c0_i32, %c0_i32_0 : i32, i32
  }
  func.func @transform_2(%arg0: i32, %arg1: i32) -> (i32, i32, i32) {
    %c0_i32 = arith.constant 0 : i32
    %c0_i32_0 = arith.constant 0 : i32
    return %arg0, %c0_i32, %arg1 : i32, i32, i32
  }
  func.func @transform_3(%arg0: i32, %arg1: i32) -> (i32, i32, i32) {
    %c0_i32 = arith.constant 0 : i32
    %c0_i32_0 = arith.constant 0 : i32
    return %arg0, %c0_i32, %arg1 : i32, i32, i32
  }
}

</mosaic_0001>

<bundles_post_ra>
// kernel: tpu_custom_call.1
= control target key start
LH: loop header
LB: loop body
LE: loop exit
PB: predicated region body
PF: predicated region fallthrough
CT: control target
= control target key end

     0   :  { %8 = vsyncpa [#allocation3], 0  ;;  %s908_s0 = inlined_call_operand.vmem [shape: f32[64,32], index: 0, kind: input, shape index: {}]   ;;  %s909_s1 = inlined_call_operand.vmem [shape: f32[64,1], index: 1, kind: input, shape index: {}]   ;;  %s910_s2 = inlined_call_operand.vmem [shape: f32[2,32,256], index: 2, kind: input, shape index: {}]   ;;  %s911_s3 = inlined_call_operand.hbm [shape: f32[2,64,256], index: 3, kind: output, shape index: {}]  }
   0x1   :  { %10 = vsyncpa [#allocation3 + $0x1], 0  ;;  %s714_s12 = smov 0   ;;  %s716_s13 = smov 0  }
   0x2   :  { %s718_s14 = smov 0   ;;  %s720_s15 = smov 0  }
   0x3   :  { %s722_s16 = smov 0   ;;  %s724_s17 = smov 0  }
   0x4 LB: > { %s513_s18 = sadd.s32 4294967295, %s687_s17   ;;  %s514_s19 = sadd.s32 4294967294, %s687_s17   ;;  %s687_s17 = sphi %s724_s17, %s16_s17   ;;  %s683_s16 = sphi %s722_s16, %s918_s16   ;;  %s679_s15 = sphi %s720_s15, %s917_s15   ;;  %s675_s14 = sphi %s718_s14, %s916_s14   ;;  %s671_s13 = sphi %s716_s13, %s915_s13   ;;  %s667_s12 = sphi %s714_s12, %s914_s12  }
   0x5   : > { %s28_s20 = sadd.s32 1, %s683_s16  ;;  %s107_s21 = sadd.s32 1, %s675_s14 }
   0x6   : > { %p30_p0 = scmp.ge.s32.totalorder %s28_s20, 2  ;;  %p117_p1 = scmp.ne.s32.totalorder %s675_s14, %s671_s13 }
   0x7   : > { %p118_p2 = scmp.eq.s32.totalorder %s513_s18, 1  ;;  %p123_p3 = scmp.ne.s32.totalorder %s671_s13, %s667_s12 }
   0x8   : > { %s920_s20 = smov (%p30_p0, %s28_s20), 0  ;;  %p124_p5 = scmp.eq.s32.totalorder %s514_s19, 1 }
   0x9   : > { %p754_p4 = por %p118_p2, %p117_p1  ;;  %s102_s23 = ssub.s32 %s683_s16, %s920_s20 }
   0xa   : > { %p517_p6 = scmp.ge.s32.totalorder %s687_s17, 1  ;;  %p105_p7 = scmp.eq.s32.totalorder %s102_s23, 0 }
   0xb   : > { %p761_p8 = por %p124_p5, %p123_p3  ;;  %p161_p9 = scmp.lt.s32.totalorder %s687_s17, 3 }
   0xc   : > { %s767_s25 = scalar_select %p105_p7, %s675_s14, %s107_s21  }
   0xd   : > { %p162_p10 = pnand %p517_p6, %p161_p9 }
   0xe   : > { %p190_p11 = scmp.lt.s32.totalorder (!%p162_p10), %s679_s15, 1  ;;  %v689_v0 = vmov (!%p162_p10), 0.0   ;;  %v690_v1 = vmov (!%p162_p10), 0   ;;  %v218_v2 = vld [vmem:[%s909_s1 + $0x10] sm:$0xff] (!%p162_p10)  ;;  %v216_v3 = vld [vmem:[%s909_s1] sm:$0xff] (!%p162_p10)  ;;  %v219_v4 = vld [vmem:[%s909_s1 + $0x18] sm:$0xff] (!%p162_p10) }
   0xf   : > { %165 = sbr.rel (%p162_p10) target bundleno = 279 (0x117), region = 32  ;;  %353 = vmatprep.mubr.f32.mxu0 (!%p162_p10), %v689_v0  ;;  %377 = vmatprep.mubr.f32.mxu1 (!%p162_p10), %v689_v0  ;;  %v217_v5 = vld [vmem:[%s909_s1 + $0x8] sm:$0xff] (!%p162_p10)  ;;  %v220_v18 = vld [vmem:[%s909_s1 + $0x20] sm:$0xff] (!%p162_p10)  ;;  %v223_v20 = vld [vmem:[%s909_s1 + $0x38] sm:$0xff] (!%p162_p10)  ;;  %vm264_vm0 = vcmask (!%p162_p10), 261120   ;;  %s186_s29 = sand.u32 (!%p162_p10), 1, %s671_s13  }
  0x10   : > { %608 = vset.pattern.permute.xlu1 (!%p162_p10), %v690_v1  ;;  %607 = vset.pattern.permute.xlu0 (!%p162_p10), %v690_v1  ;;  %v221_v17 = vld [vmem:[%s909_s1 + $0x28] sm:$0xff] (!%p162_p10)  ;;  %v222_v21 = vld [vmem:[%s909_s1 + $0x30] sm:$0xff] (!%p162_p10)  ;;  %v200_v22 = vld [vmem:[%s908_s0] sm:$0xff] (!%p162_p10)  ;;  %s518_s30 = sshll.u32 (!%p162_p10), %s186_s29, 7  ;;  %s535_s5 = sshll.u32 (!%p162_p10), %s679_s15, 11 }
  0x11   : > { %236 = vperm.xlu1 (!%p162_p10), %608, %v218_v2   ;;  %226 = vperm.xlu0 (!%p162_p10), %607, %v216_v3   ;;  %v204_v23 = vld [vmem:[%s908_s0 + $0x20] sm:$0xff] (!%p162_p10)  ;;  %v201_v24 = vld [vmem:[%s908_s0 + $0x8] sm:$0xff] (!%p162_p10)  ;;  %v202_v26 = vld [vmem:[%s908_s0 + $0x10] sm:$0xff] (!%p162_p10)  ;;  %s852_s8 = scalar_lea.hbm (!%p162_p10), %s911_s3, %s535_s5  ;;  %s691_s11 = smov (!%p162_p10), [#allocation2]  }
  0x12   : > { %v205_v25 = vld [vmem:[%s908_s0 + $0x28] sm:$0xff] (!%p162_p10)  ;;  %v206_v27 = vld [vmem:[%s908_s0 + $0x30] sm:$0xff] (!%p162_p10)  ;;  %v203_v28 = vld [vmem:[%s908_s0 + $0x18] sm:$0xff] (!%p162_p10)  ;;  %s613_s18 = sshll.u32 (!%p162_p10), %s691_s11, 4  ;;  %s614_s18 = int_to_ptr.vmem [resolvable:$false] %s613_s18 }
  0x13   : > { %v207_v29 = vld [vmem:[%s908_s0 + $0x38] sm:$0xff] (!%p162_p10)  ;;  %s615_s19 = scalar_lea.vmem (!%p162_p10), %s614_s18, 4096 }
  0x15   : > { %241 = vperm.xlu1 (!%p162_p10), %608, %v219_v4   ;;  %231 = vperm.xlu0 (!%p162_p10), %607, %v217_v5  }
  0x16   : > { %s191_s26 = scalar_select %p190_p11, %s679_s15, 1 }
  0x18   : > { %s534_s4 = sshll.u32 %s191_s26, 6 }
  0x19   : > { %s197_s9 = scalar_lea.vmem %s910_s2, %s534_s4  ;;  %251 = vperm.xlu1 %608, %v221_v17   ;;  %246 = vperm.xlu0 %607, %v220_v18   ;;  %s833_s4 = scalar_lea.vmem [#allocation2], %s518_s30 }
  0x1a   : > { %v209_v6 = vld [vmem:[%s197_s9 + $0x8] sm:$0xff]  ;;  %v211_v7 = vld [vmem:[%s197_s9 + $0x18] sm:$0xff]  ;;  %v208_v8 = vld [vmem:[%s197_s9] sm:$0xff]  ;;  %s434_s6 = sshll.u32 %s833_s4, 4  ;;  %s854_s6 = int_to_ptr.vmem [resolvable:$true] %s434_s6 }
  0x1b   : > { %v536_v9 = vpack.c.bf16 %v211_v7, %v209_v6  ;;  %v210_v10 = vld [vmem:[%s197_s9 + $0x10] sm:$0xff]  ;;  %v213_v11 = vld [vmem:[%s197_s9 + $0x28] sm:$0xff]  ;;  %v215_v12 = vld [vmem:[%s197_s9 + $0x38] sm:$0xff]  ;;  %s609_s10 = scalar_lea.vmem %s854_s6, 2048  ;;  %p616_p1 = scmp.lt.s32.totalorder %s854_s6, %s614_s18 }
  0x1c   : > { %v538_v13 = vpack.c.bf16 %v210_v10, %v208_v8  ;;  %v540_v14 = vpack.c.bf16 %v215_v12, %v213_v11  ;;  %v212_v15 = vld [vmem:[%s197_s9 + $0x20] sm:$0xff]  ;;  %v214_v16 = vld [vmem:[%s197_s9 + $0x30] sm:$0xff]  ;;  %s862_s9 = scalar_lea.sflag [#allocation3], %s186_s29  ;;  %p610_p12 = scmp.ne.s32.totalorder %s854_s6, %s609_s10 }
  0x1d   : > { %537 = vmatprep.subr.bf16.mxu0 %v536_v9  ;;  %544 = vmatprep.subr.bf16.mxu1 %v536_v9  ;;  %v542_v19 = vpack.c.bf16 %v214_v16, %v212_v15  ;;  %p617_p2 = scmp.lt.s32.totalorder %s615_s19, %s609_s10 }
  0x1e   : > { %539 = vmatpush1.bf16.msra.mxu0 %v538_v13  ;;  %546 = vmatpush1.bf16.msra.mxu1 %v538_v13  ;;  %p611_p13 = pnand %p610_p12, %p754_p4 }
  0x1f   : > { %541 = vmatprep.subr.bf16.mxu0 %v540_v14  ;;  %545 = vmatprep.subr.bf16.mxu1 %v540_v14  ;;  %p618_p3 = por %p617_p2, %p616_p1 }
  0x20   : > { %261 = vperm.xlu1 %608, %v223_v20   ;;  %256 = vperm.xlu0 %607, %v222_v21   ;;  %p612_p0 = pneg %p611_p13 }
  0x22   : > { %543 = vmatpush1.bf16.msra.mxu0 %v542_v19  ;;  %547 = vmatpush1.bf16.msra.mxu1 %v542_v19  ;;  %p619_p5 = pnand %p618_p3, %p612_p0 }
  0x25   : > { %521 = vmatmul.mubr.msk.f32.vlgmr.msra.gmra.mrb[0].mxu0 %vm264_vm0, %v200_v22  ;;  %525 = vmatmul.mubr.msk.f32.vlgmr.msra.gmra.mrb[0].mxu1 %vm264_vm0, %v204_v23 }
  0x26   : > { %359 = vmatprep.mubr.f32.mxu0 %v689_v0  ;;  %383 = vmatprep.mubr.f32.mxu1 %v689_v0 }
  0x29   : > { %522 = vmatmul.mubr.msk.f32.gmra.mrb[2].mxu0 %vm264_vm0, %v201_v24  ;;  %526 = vmatmul.mubr.msk.f32.gmra.mrb[2].mxu1 %vm264_vm0, %v205_v25 }
  0x2a   : > { %365 = vmatprep.mubr.f32.mxu0 %v689_v0  ;;  %389 = vmatprep.mubr.f32.mxu1 %v689_v0 }
  0x2d   : > { %523 = vmatmul.mubr.msk.f32.gmra.mrb[4].mxu0 %vm264_vm0, %v202_v26  ;;  %527 = vmatmul.mubr.msk.f32.gmra.mrb[4].mxu1 %vm264_vm0, %v206_v27 }
  0x2e   : > { %371 = vmatprep.mubr.f32.mxu0 %v689_v0  ;;  %395 = vmatprep.mubr.f32.mxu1 %v689_v0 }
  0x31   : > { %524 = vmatmul.mubr.msk.f32.gmra.mrb[6].mxu0 %vm264_vm0, %v203_v28  ;;  %528 = vmatmul.mubr.msk.f32.gmra.mrb[6].mxu1 %vm264_vm0, %v207_v29 }
  0x90   : > { %v227_v30 = vpop.permute.xlu0 %226  ;;  %v237_v31 = vpop.permute.xlu1 %236 }
  0x94   : > { %v232_v32 = vpop.permute.xlu0 %231  ;;  %v242_v33 = vpop.permute.xlu1 %241 }
  0x98   : > { %v247_v34 = vpop.permute.xlu0 %246  ;;  %v252_v43 = vpop.permute.xlu1 %251 }
  0x9f   : > { %v257_v52 = vpop.permute.xlu0 %256  ;;  %v262_v61 = vpop.permute.xlu1 %261 }
  0xf8   : > { %v355_v35 = vpop.f32.mrb[0].mxu0  ;;  %v379_v36 = vpop.f32.mrb[0].mxu1 }
  0xf9   : > { %v356_v37 = vadd.f32 %v355_v35, %v227_v30  ;;  %v380_v38 = vadd.f32 %v379_v36, %v247_v34  ;;  %v357_v39 = vpop.f32.mrb[1].mxu0  ;;  %v381_v40 = vpop.f32.mrb[1].mxu1 }
  0xfa   : > { %v358_v41 = vadd.f32 %v357_v39, %v227_v30  ;;  %v382_v42 = vadd.f32 %v381_v40, %v247_v34 }
  0xfb   : > { %402 = vst [vmem:[%s833_s4] sm:$0xff] %v356_v37  ;;  %410 = vst [vmem:[%s833_s4 + $0x40] sm:$0xff] %v380_v38 }
  0xfc   : > { %403 = vst [vmem:[%s833_s4 + $0x8] sm:$0xff] %v358_v41  ;;  %411 = vst [vmem:[%s833_s4 + $0x48] sm:$0xff] %v382_v42  ;;  %v361_v44 = vpop.f32.mrb[2].mxu0  ;;  %v385_v45 = vpop.f32.mrb[2].mxu1 }
  0xfd   : > { %v362_v46 = vadd.f32 %v361_v44, %v232_v32  ;;  %v386_v47 = vadd.f32 %v385_v45, %v252_v43  ;;  %v363_v48 = vpop.f32.mrb[3].mxu0  ;;  %v387_v49 = vpop.f32.mrb[3].mxu1 }
  0xfe   : > { %v364_v50 = vadd.f32 %v363_v48, %v232_v32  ;;  %v388_v51 = vadd.f32 %v387_v49, %v252_v43 }
  0xff   : > { %404 = vst [vmem:[%s833_s4 + $0x10] sm:$0xff] %v362_v46  ;;  %412 = vst [vmem:[%s833_s4 + $0x50] sm:$0xff] %v386_v47 }
 0x100   : > { %405 = vst [vmem:[%s833_s4 + $0x18] sm:$0xff] %v364_v50  ;;  %413 = vst [vmem:[%s833_s4 + $0x58] sm:$0xff] %v388_v51  ;;  %v367_v53 = vpop.f32.mrb[4].mxu0  ;;  %v391_v54 = vpop.f32.mrb[4].mxu1 }
 0x101   : > { %v368_v55 = vadd.f32 %v367_v53, %v237_v31  ;;  %v392_v56 = vadd.f32 %v391_v54, %v257_v52  ;;  %v369_v57 = vpop.f32.mrb[5].mxu0  ;;  %v393_v58 = vpop.f32.mrb[5].mxu1 }
 0x102   : > { %v370_v59 = vadd.f32 %v369_v57, %v237_v31  ;;  %v394_v60 = vadd.f32 %v393_v58, %v257_v52 }
 0x103   : > { %406 = vst [vmem:[%s833_s4 + $0x20] sm:$0xff] %v368_v55  ;;  %414 = vst [vmem:[%s833_s4 + $0x60] sm:$0xff] %v392_v56 }
 0x104   : > { %407 = vst [vmem:[%s833_s4 + $0x28] sm:$0xff] %v370_v59  ;;  %415 = vst [vmem:[%s833_s4 + $0x68] sm:$0xff] %v394_v60  ;;  %v373_v62 = vpop.f32.mrb[6].mxu0  ;;  %v397_v63 = vpop.f32.mrb[6].mxu1 }
 0x105   : > { %v374_v0 = vadd.f32 %v373_v62, %v242_v33  ;;  %v398_v1 = vadd.f32 %v397_v63, %v262_v61  ;;  %v375_v2 = vpop.f32.mrb[7].mxu0  ;;  %v399_v3 = vpop.f32.mrb[7].mxu1 }
 0x106   : > { %v376_v4 = vadd.f32 %v375_v2, %v242_v33  ;;  %v400_v5 = vadd.f32 %v399_v3, %v262_v61 }
 0x107   : > { %408 = vst [vmem:[%s833_s4 + $0x30] sm:$0xff] %v374_v0  ;;  %416 = vst [vmem:[%s833_s4 + $0x70] sm:$0xff] %v398_v1 }
 0x108   : > { %409 = vst [vmem:[%s833_s4 + $0x38] sm:$0xff] %v376_v4  ;;  %417 = vst [vmem:[%s833_s4 + $0x78] sm:$0xff] %v400_v5 }
 0x109   : > { %622 = shalt.err (!%p619_p5)
}
 0x10a   : > { %s623_s21 = scalar_lea.hbm %s852_s8, 2048  ;;  %s627_s27 = scalar_lea.hbm %s911_s3, 4096 }
 0x10b   : > { %p624_p6 = scmp.ne.s32.totalorder %s852_s8, %s623_s21  ;;  %p628_p10 = scmp.lt.u32.totalorder %s852_s8, %s911_s3 }
 0x10c   : > { %p629_p11 = scmp.lt.u32.totalorder %s627_s27, %s623_s21  ;;  %p631_p13 = scmp.lt.u32.totalorder %s623_s21, %s852_s8 }
 0x10d   : > { %p625_p7 = pnand %p624_p6, %p754_p4 }
 0x10e   : > { %p630_p12 = por %p629_p11, %p628_p10 }
 0x10f   : > { %p626_p9 = pneg %p625_p7 }
 0x110   : > { %p632_p0 = por %p631_p13, %p630_p12 }
 0x112   : > { %p633_p1 = pnand %p632_p0, %p626_p9 }
 0x114   : > { %636 = shalt.err (!%p633_p1)
}
 0x115   : > { %s692_s30 = smov 256   ;;  %s693_s4 = smov 16  }
 0x116   : > { %548 = dma.vmem_to_hbm [thread:$0]  (%p754_p4), %s854_s6, 2048, %s852_s8, %s862_s9, %s692_s30, %s692_s30, %s693_s4  }
 0x117 PF: > { %p554_p2 = scmp.ge.s32.totalorder %s687_s17, 2  ;;  %s449_s5 = sand.u32 1, %s667_s12  }
 0x118   : > { %s450_s7 = scalar_lea.sflag [#allocation3], %s449_s5 }
 0x119   : > { %p551_p3 = pnand %p554_p2, %p761_p8 }
 0x11b   : > { %662 = dma.done.wait (!%p551_p3), %s450_s7, 2048  }
 0x11c   : > { %664 = vsyncadd (!%p551_p3), %s450_s7, 4294965248  ;;  %s16_s17 = sadd.s32 1, %s687_s17   ;;  %s914_s12 = smov %s671_s13 }
 0x11d   : > { %p13_p5 = scmp.ge.s32.totalorder %s16_s17, 4   ;;  %s915_s13 = smov %s675_s14 }
 0x11e   : > { %s916_s14 = smov %s767_s25  ;;  %s917_s15 = smov %s683_s16 }
 0x11f   : > { %s918_s16 = smov %s920_s20  ;;  %15 = sbr.rel (!%p13_p5) target bundleno = 4 (0x4), region = 67 }
 0x126   :  { %455 = vsyncpa [#allocation3], 1 }
 0x127   :  { %457 = vsyncpa [#allocation3 + $0x1], 1 }

</bundles_post_ra>
